<compile_context>
chip_gen: v7x
topology: tpu7x:2x2x1
jax: 0.10.0
libtpu: 0.0.40
codegen_flags: <defaults>
</compile_context>

<pallas_src>
import math

import jax
import jax.numpy as jnp
from jax.experimental import pallas as pl
from jax.experimental.pallas import tpu as pltpu

HIDDEN = 64        # logical hidden width of the PyTorch model
LANE = 128
H_PAD = 128        # hidden width padded to a full lane register
C_PAD = 128        # class axis padded to a full lane register


def _round_up(x, m):
    return ((x + m - 1) // m) * m


def _nbytes(shape, dtype):
    return math.prod(shape) * jnp.dtype(dtype).itemsize


def _vmem_limit(nbytes, *, floor=32 << 20, ceil=48 << 20, margin=4 << 20):
    # floor overrides v5e's 16 MiB scoped default; ceil leaves headroom inside
    # v7x's 64 MiB per-TensorCore physical VMEM.
    return int(min(ceil, max(floor, nbytes + margin)))


# ---------------------------------------------------------------------------
# Kernel 1: per-node feature transform  XW1[tile] = X[tile] @ W1   (128 lanes)
# ---------------------------------------------------------------------------
def xw1_kernel(x_ref, w1_ref, o_ref):
    o_ref[...] = jnp.dot(
        x_ref[...], w1_ref[...], preferred_element_type=jnp.float32
    ).astype(o_ref.dtype)


# ---------------------------------------------------------------------------
# Kernel 2 (fused, 2-phase grid, A_hat VMEM-resident -> single HBM read of A):
#   phase 0 (p==0): h1[tile] = relu(A[tile, :] @ XW1 + b1)  -> VMEM scratch
#   phase 1 (p==1): h2 = relu((A[tile, :] @ h1) @ W2 + b2)
#                   h3 = relu(h2 @ Wf1 + bf1); h4 = relu(h3 @ Wf2 + bf2)
#                   out[tile] = log_softmax(h4 @ Wf3_pad + bf3_pad)
# ---------------------------------------------------------------------------
def make_fused_kernel(row_tile, n_pad_c):
    def fused_kernel(a_ref, xw1_ref, b1_ref,
                     w2_ref, b2_ref,
                     wf1_ref, bf1_ref, wf2_ref, bf2_ref, wf3_ref, bf3_ref,
                     o_ref, h1_ref):
        p = pl.program_id(0)
        i = pl.program_id(1)
        row0 = pl.multiple_of(i * row_tile, row_tile)

        @pl.when(p == 0)
        def _phase0():
            a_tile = a_ref[pl.ds(row0, row_tile), :]          # [tm, n_pad_c] bf16
            agg = jnp.dot(a_tile, xw1_ref[:n_pad_c, :],
                          preferred_element_type=jnp.float32)
            h1 = jnp.maximum(agg + b1_ref[...], 0.0)
            h1_ref[pl.ds(row0, row_tile), :] = h1.astype(h1_ref.dtype)

        @pl.when(p == 1)
        def _phase1():
            a_tile = a_ref[pl.ds(row0, row_tile), :]
            agg = jnp.dot(a_tile, h1_ref[:n_pad_c, :],
                          preferred_element_type=jnp.float32)
            # dropout: identity (eval mode)
            h = jnp.maximum(
                jnp.dot(agg.astype(jnp.bfloat16), w2_ref[...],
                        preferred_element_type=jnp.float32) + b2_ref[...], 0.0)
            h = jnp.maximum(
                jnp.dot(h.astype(jnp.bfloat16), wf1_ref[...],
                        preferred_element_type=jnp.float32) + bf1_ref[...], 0.0)
            h = jnp.maximum(
                jnp.dot(h.astype(jnp.bfloat16), wf2_ref[...],
                        preferred_element_type=jnp.float32) + bf2_ref[...], 0.0)
            logits = jnp.dot(h.astype(jnp.bfloat16), wf3_ref[...],
                             preferred_element_type=jnp.float32) + bf3_ref[...]
            # log_softmax over the lane-padded class axis; padded lanes carry a
            # -1e30 f32 bias so they never win the max and contribute exp == 0.
            m = jnp.max(logits, axis=1, keepdims=True)
            z = logits - m
            lse = jnp.log(jnp.sum(jnp.exp(z), axis=1, keepdims=True))
            o_ref[...] = (z - lse).astype(o_ref.dtype)

    return fused_kernel


def gcn_net_forward(a_hat, x, params, *, row_tile=512):
    """Eval-mode forward of the Cora GCN `Net`.

    a_hat : [N, N] dense symmetric-normalized adjacency (float32)
    x     : [N, F] node features (float32)
    params: weights pre-transposed to [in, out]; biases as [1, out] (float32)
    """
    n, f = x.shape
    num_classes = params["wf3"].shape[1]

    row_tile = max(LANE, _round_up(row_tile, LANE))
    n_pad_r = _round_up(n, row_tile)     # A_hat row / output padding
    n_pad_c = _round_up(n, LANE)         # A_hat column (reduction) padding
    f_pad = _round_up(f, LANE)
    n_tiles = n_pad_r // row_tile

    # --- wrapper-side padding / bf16 casts --------------------------------
    a_p = jnp.zeros((n_pad_r, n_pad_c), jnp.bfloat16).at[:n, :n].set(
        a_hat.astype(jnp.bfloat16))
    x_p = jnp.zeros((n_pad_r, f_pad), jnp.bfloat16).at[:n, :f].set(
        x.astype(jnp.bfloat16))

    def pad_w(w, rows, cols):
        r, c = w.shape
        return jnp.zeros((rows, cols), jnp.bfloat16).at[:r, :c].set(
            w.astype(jnp.bfloat16))

    def pad_b(b, cols, fill=0.0):
        out = jnp.full((1, cols), fill, jnp.float32)
        return out.at[:, :b.shape[1]].set(b.astype(jnp.float32))

    w1_p = pad_w(params["w1"], f_pad, H_PAD)
    b1_p = pad_b(params["b1"], H_PAD)
    w2_p = pad_w(params["w2"], H_PAD, H_PAD)
    b2_p = pad_b(params["b2"], H_PAD)
    wf1_p = pad_w(params["wf1"], H_PAD, H_PAD)
    bf1_p = pad_b(params["bf1"], H_PAD)
    wf2_p = pad_w(params["wf2"], H_PAD, H_PAD)
    bf2_p = pad_b(params["bf2"], H_PAD)
    wf3_p = pad_w(params["wf3"], H_PAD, C_PAD)
    bf3_p = pad_b(params["bf3"], C_PAD, fill=-1e30)

    def const_spec(shape):
        return pl.BlockSpec(shape, lambda p, i: (0, 0))  # VMEM-resident

    # ---- kernel 1: XW1 = X @ W1  -> [n_pad_r, 128] bf16 (lane-dense) -------
    vmem1 = _vmem_limit(
        2 * _nbytes((row_tile, f_pad), jnp.bfloat16)
        + 2 * _nbytes((f_pad, H_PAD), jnp.bfloat16)
        + 2 * _nbytes((row_tile, H_PAD), jnp.bfloat16))
    xw1 = pl.pallas_call(
        xw1_kernel,
        grid=(n_tiles,),
        in_specs=[pl.BlockSpec((row_tile, f_pad), lambda i: (i, 0)),
                  pl.BlockSpec((f_pad, H_PAD), lambda i: (0, 0))],
        out_specs=pl.BlockSpec((row_tile, H_PAD), lambda i: (i, 0)),
        out_shape=jax.ShapeDtypeStruct((n_pad_r, H_PAD), jnp.bfloat16),
        compiler_params=pltpu.CompilerParams(
            dimension_semantics=("parallel",),       # megacore row-split
            vmem_limit_bytes=vmem1),
    )(x_p, w1_p)

    # ---- kernel 2: fused conv1-agg + conv2-agg + fc head + log_softmax -----
    vmem2 = _vmem_limit(
        2 * _nbytes((n_pad_r, n_pad_c), jnp.bfloat16)      # resident A_hat
        + 2 * _nbytes((n_pad_r, H_PAD), jnp.bfloat16)      # resident XW1
        + 2 * 8 * _nbytes((H_PAD, H_PAD), jnp.bfloat16)    # weights + biases
        + 2 * _nbytes((row_tile, C_PAD), jnp.float32)      # output block
        + _nbytes((n_pad_r, H_PAD), jnp.bfloat16))         # h1 scratch
    fused = make_fused_kernel(row_tile, n_pad_c)
    out_p = pl.pallas_call(
        fused,
        grid=(2, n_tiles),                                 # (phase, row tile)
        in_specs=[const_spec((n_pad_r, n_pad_c)),          # A_hat (read once)
                  const_spec((n_pad_r, H_PAD)),            # XW1
                  const_spec((1, H_PAD)),                  # b1
                  const_spec((H_PAD, H_PAD)), const_spec((1, H_PAD)),   # W2,b2
                  const_spec((H_PAD, H_PAD)), const_spec((1, H_PAD)),   # Wf1,bf1
                  const_spec((H_PAD, H_PAD)), const_spec((1, H_PAD)),   # Wf2,bf2
                  const_spec((H_PAD, C_PAD)), const_spec((1, C_PAD))],  # Wf3,bf3
        # Output block stays pinned at 0 during phase 0 (never written) and is
        # streamed out tile-by-tile during phase 1 -> each block written once.
        out_specs=pl.BlockSpec((row_tile, C_PAD), lambda p, i: (p * i, 0)),
        out_shape=jax.ShapeDtypeStruct((n_pad_r, C_PAD), jnp.float32),
        scratch_shapes=[pltpu.VMEM((n_pad_r, H_PAD), jnp.bfloat16)],    # h1
        compiler_params=pltpu.CompilerParams(
            # phase axis must be sequential; tile axis also sequential because
            # phase 1 consumes every phase-0 h1 row from the shared scratch.
            dimension_semantics=("arbitrary", "arbitrary"),
            vmem_limit_bytes=vmem2),
    )(a_p, xw1, b1_p, w2_p, b2_p, wf1_p, bf1_p, wf2_p, bf2_p, wf3_p, bf3_p)

    return out_p[:n, :num_classes]


def gcn_net_reference(a_hat, x, params):
    """Pure-JAX f32 reference (eval mode)."""
    h = jnp.maximum(a_hat @ (x @ params["w1"]) + params["b1"], 0.0)
    h = jnp.maximum(a_hat @ (h @ params["w2"]) + params["b2"], 0.0)
    h = jnp.maximum(h @ params["wf1"] + params["bf1"], 0.0)
    h = jnp.maximum(h @ params["wf2"] + params["bf2"], 0.0)
    logits = h @ params["wf3"] + params["bf3"]
    return jax.nn.log_softmax(logits, axis=1)


def make_normalized_adjacency(edge_index, n_nodes):
    """Dense GCN adjacency: A_hat = D^{-1/2} (A + A^T + I) D^{-1/2} (glue, plain JAX)."""
    src, dst = edge_index[0], edge_index[1]
    a = jnp.zeros((n_nodes, n_nodes), jnp.float32)
    a = a.at[src, dst].set(1.0)
    a = jnp.maximum(a, a.T)                       # undirected
    a = a + jnp.eye(n_nodes, dtype=jnp.float32)   # self-loops
    deg = jnp.sum(a, axis=1)
    d_inv_sqrt = jnp.where(deg > 0, 1.0 / jnp.sqrt(deg), 0.0)
    return a * d_inv_sqrt[:, None] * d_inv_sqrt[None, :]


if __name__ == "__main__":
    # Small synthetic "Cora-like" graph (real Cora: N=2708, F=1433, C=7).
    N_NODES = 200
    N_FEATURES = 32
    NUM_CLASSES = 7
    N_EDGES = 800

    key = jax.random.PRNGKey(0)
    keys = jax.random.split(key, 10)

    x = jax.random.normal(keys[0], (N_NODES, N_FEATURES), jnp.float32)
    edge_index = jax.random.randint(keys[1], (2, N_EDGES), 0, N_NODES, jnp.int32)
    a_hat = make_normalized_adjacency(edge_index, N_NODES)

    def glorot(k, fan_in, fan_out):
        lim = jnp.sqrt(6.0 / (fan_in + fan_out))
        # stored directly as [in, out] (i.e. PyTorch weight transposed)
        return jax.random.uniform(k, (fan_in, fan_out), jnp.float32, -lim, lim)

    params = {
        # GCNConv1: n_features -> 64
        "w1": glorot(keys[2], N_FEATURES, HIDDEN),
        "b1": jnp.zeros((1, HIDDEN), jnp.float32),
        # GCNConv2: 64 -> 64
        "w2": glorot(keys[3], HIDDEN, HIDDEN),
        "b2": jnp.zeros((1, HIDDEN), jnp.float32),
        # fc1, fc2: 64 -> 64
        "wf1": glorot(keys[4], HIDDEN, HIDDEN),
        "bf1": 0.01 * jax.random.normal(keys[5], (1, HIDDEN), jnp.float32),
        "wf2": glorot(keys[6], HIDDEN, HIDDEN),
        "bf2": 0.01 * jax.random.normal(keys[7], (1, HIDDEN), jnp.float32),
        # fc3: 64 -> num_classes
        "wf3": glorot(keys[8], HIDDEN, NUM_CLASSES),
        "bf3": 0.01 * jax.random.normal(keys[9], (1, NUM_CLASSES), jnp.float32),
    }

    out = gcn_net_forward(a_hat, x, params, row_tile=128)   # 2 row tiles, 2 phases
    out = jax.block_until_ready(out)

    assert out.shape == (N_NODES, NUM_CLASSES)
    # log_softmax rows should sum (in prob space) to ~1
    assert bool(jnp.all(jnp.abs(jnp.sum(jnp.exp(out), axis=1) - 1.0) < 1e-3))
    # match the f32 reference (bf16 A_hat/X/weights introduce small error)
    ref = gcn_net_reference(a_hat, x, params)
    max_err = float(jnp.max(jnp.abs(out - ref)))
    assert max_err < 0.15, f"max abs err vs reference too large: {max_err}"
    print("KERNEL_OK")
</pallas_src>

<mosaic_0001>
module attributes {stable_mosaic.version = 11 : i64} {
  func.func @xw1_kernel(%arg0: i32, %arg1: memref<128x128xbf16, #tpu.memory_space<vmem>>, %arg2: memref<128x128xbf16, #tpu.memory_space<vmem>>, %arg3: memref<128x128xbf16, #tpu.memory_space<vmem>>) attributes {dimension_semantics = [#tpu.dimension_semantics<parallel>], iteration_bounds = array<i64: 2>, scalar_prefetch = 0 : i64, scratch_operands = 0 : i64, tpu.core_type = #tpu.core_type<tc>, window_params = [{transform_indices = @transform_0, window_bounds = array<i64: 128, 128>}, {pipeline_mode = #tpu.pipeline_mode<synchronous>, transform_indices = @transform_1, window_bounds = array<i64: 128, 128>}, {transform_indices = @transform_2, window_bounds = array<i64: 128, 128>}]} {
    %c0 = arith.constant 0 : index
    %c0_0 = arith.constant 0 : index
    %0 = vector.load %arg1[%c0, %c0_0] : memref<128x128xbf16, #tpu.memory_space<vmem>>, vector<128x128xbf16>
    %c0_1 = arith.constant 0 : index
    %c0_2 = arith.constant 0 : index
    %1 = vector.load %arg2[%c0_1, %c0_2] : memref<128x128xbf16, #tpu.memory_space<vmem>>, vector<128x128xbf16>
    %cst = arith.constant dense<0.000000e+00> : vector<128x128xf32>
    %2 = tpu.matmul %0, %1, %cst {dimension_numbers = #tpu.dot_dimension_numbers<[1], [0], [0], [1], [0, 0, 1, 1], [], []>} : vector<128x128xbf16>, vector<128x128xbf16>, vector<128x128xf32> -> vector<128x128xf32>
    %3 = arith.truncf %2 : vector<128x128xf32> to vector<128x128xbf16>
    %c0_3 = arith.constant 0 : index
    %c0_4 = arith.constant 0 : index
    %4 = vector.load %arg3[%c0_3, %c0_4] : memref<128x128xbf16, #tpu.memory_space<vmem>>, vector<128x128xbf16>
    tpu.vector_store %arg3[%c0_3, %c0_4], %3 {strides = array<i32>} : memref<128x128xbf16, #tpu.memory_space<vmem>>, vector<128x128xbf16>,
    return
  }
  func.func @transform_0(%arg0: i32) -> (i32, i32) {
    %c0_i32 = arith.constant 0 : i32
    %c0_i32_0 = arith.constant 0 : i32
    return %arg0, %c0_i32 : i32, i32
  }
  func.func @transform_1(%arg0: i32) -> (i32, i32) {
    %c0_i32 = arith.constant 0 : i32
    %c0_i32_0 = arith.constant 0 : i32
    %c0_i32_1 = arith.constant 0 : i32
    return %c0_i32, %c0_i32_0 : i32, i32
  }
  func.func @transform_2(%arg0: i32) -> (i32, i32) {
    %c0_i32 = arith.constant 0 : i32
    %c0_i32_0 = arith.constant 0 : i32
    return %arg0, %c0_i32 : i32, i32
  }
}

</mosaic_0001>

<bundles_post_ra>
// kernel: tpu_custom_call.1
= control target key start
LH: loop header
LB: loop body
LE: loop exit
PB: predicated region body
PF: predicated region fallthrough
CT: control target
= control target key end

     0   :  { %7 = vsyncpa [#allocation3], 0  ;;  %s1209_s0 = inlined_call_operand.hbm [shape: bf16[256,128], index: 0, kind: input, shape index: {}]   ;;  %s1210_s1 = inlined_call_operand.hbm [shape: bf16[128,128], index: 1, kind: input, shape index: {}]   ;;  %s1211_s2 = inlined_call_operand.hbm [shape: bf16[256,128], index: 2, kind: output, shape index: {}]  }
   0x1   :  { %9 = vsyncpa [#allocation3 + $0x1], 0 }
   0x2   :  { %10 = vsyncpa [#allocation6], 0 }
   0x3   :  { %11 = vsyncpa [#allocation4], 0 }
   0x4   :  { %13 = vsyncpa [#allocation4 + $0x1], 0  ;;  %s988_s9 = smov 0   ;;  %s990_s10 = smov 0  }
   0x5   :  { %s992_s11 = smov 0   ;;  %s994_s12 = smov 0  }
   0x6 LB: > { %s1009_s13 = sadd.s32 4294967295, %s964_s12   ;;  %s582_s14 = sadd.s32 4294967294, %s964_s12   ;;  %s964_s12 = sphi %s994_s12, %s1231_s12   ;;  %s960_s11 = sphi %s992_s11, %s1230_s11   ;;  %s956_s10 = sphi %s990_s10, %s1229_s10   ;;  %s952_s9 = sphi %s988_s9, %s1228_s9  }
   0x7   : > { %p39_p0 = scmp.ne.s32.totalorder %s956_s10, %s952_s9  ;;  %p1212_p1 = scmp.eq.s32.totalorder %s1009_s13, 0 }
   0x8   : > { %p90_p3 = scmp.eq.s32.totalorder %s582_s14, 1  ;;  %p583_p5 = scmp.ge.s32.totalorder %s964_s12, 1 }
   0x9   : > { %p1018_p4 = por %p1212_p1, %p39_p0  ;;  %p97_p7 = scmp.lt.s32.totalorder %s964_s12, 3 }
   0xa   : > { %p1023_p6 = por %p90_p3, %p39_p0  ;;  %s966_s18 = smov [#allocation5]  }
   0xb   : > { %s1215_s15 = scalar_select %p1018_p4, 1, 0 }
   0xc   : > { %s1216_s16 = scalar_select %p1023_p6, 1, 0 }
   0xd   : > { %p1028_p8 = pnand %p583_p5, %p97_p7  ;;  %s109_s19 = sshll.u32 %s966_s18, 4  ;;  %s1032_s19 = int_to_ptr.vmem [resolvable:$true] %s109_s19 }
   0xe   : > { %s1044_s21 = sadd.s32 1, %s964_s12   ;;  %s26_s22 = sadd.s32 1, %s960_s11 }
   0xf   : > { %s1217_s17 = scalar_select %p1028_p8, 1, 0 }
  0x10   : > { %p767_p9 = pneg %p1028_p8  ;;  %s23_s23 = ssub.s32 %s964_s12, %s1044_s21 }
  0x11   : > { %s836_s26 = scalar_lea.hbm %s1210_s1, 1024 }
  0x12   : > { %p1039_p11 = pnand %p767_p9, %p1212_p1  ;;  %p837_p12 = scmp.ne.s32.totalorder %s1210_s1, %s836_s26 }
  0x13   : > { %p843_p5 = scmp.lt.u32.totalorder %s836_s26, %s1210_s1 }
  0x14   : > { %p838_p13 = pneg %p1039_p11 }
  0x16   : > { %p839_p0 = pnand %p838_p13, %p837_p12 }
  0x18   : > { %p840_p3 = pneg %p839_p0 }
  0x1a   : > { %p845_p7 = pnand %p843_p5, %p840_p3 }
  0x1c   : > { %848 = shalt.err (!%p845_p7)
}
  0x1d   : > { %s849_s3 = scalar_lea.vmem %s1032_s19, 1024  ;;  %p857_p2 = scmp.lt.s32.totalorder %s1032_s19, %s1032_s19 }
  0x1e   : > { %p850_p9 = scmp.ne.s32.totalorder %s1032_s19, %s849_s3  ;;  %p858_p6 = scmp.lt.s32.totalorder %s849_s3, %s849_s3 }
  0x20   : > { %p852_p10 = pnand %p850_p9, %p838_p13  ;;  %p859_p4 = por %p858_p6, %p857_p2 }
  0x22   : > { %p853_p1 = pneg %p852_p10 }
  0x24   : > { %p860_p8 = pnand %p859_p4, %p853_p1 }
  0x26   : > { %863 = shalt.err (!%p860_p8)
}
  0x27   : > { %s967_s4 = smov 64   ;;  %s968_s5 = smov 4  }
  0x28   : > { %770 = dma.hbm_to_vmem [thread:$0]  (!%p1039_p11), %s1210_s1, 1024, %s1032_s19, [#allocation6], %s967_s4, %s967_s4, %s968_s5  }
  0x29   : > { %p24_p1 = scmp.eq.s32.totalorder %s23_s23, 0  ;;  %p33_p2 = scmp.ne.s32.totalorder %s960_s11, %s956_s10 }
  0x2a   : > { %p34_p4 = scmp.eq.s32.totalorder %s964_s12, 0  ;;  %p780_p6 = scmp.lt.s32.totalorder %s964_s12, 2 }
  0x2b   : > { %s1078_s8 = scalar_select %p24_p1, %s960_s11, %s26_s22  }
  0x2c   : > { %p35_p8 = por %p34_p4, %p33_p2  ;;  %p1219_p10 = scmp.eq.s32.totalorder %s1009_s13, 1 }
  0x2d   : > { %s123_s18 = sand.u32 1, %s960_s11   ;;  %s630_s20 = sshll.u32 %s964_s12, 10 }
  0x2e   : > { %p1082_p12 = por %p1219_p10, %p33_p2  ;;  %s586_s24 = sshll.u32 %s123_s18, 6 }
  0x2f   : > { %s1091_s27 = scalar_lea.hbm %s1209_s0, %s630_s20  ;;  %s127_s19 = scalar_lea.vmem [#allocation2], %s586_s24 }
  0x30   : > { %s134_s22 = sshll.u32 %s127_s19, 4  ;;  %p1093_p11 = pnand %p780_p6, %p35_p8  ;;  %s1097_s22 = int_to_ptr.vmem [resolvable:$true] %s134_s22 }
  0x31   : > { %s1099_s28 = scalar_lea.sflag [#allocation3], %s123_s18  ;;  %s864_s29 = scalar_lea.hbm %s1091_s27, 1024 }
  0x32   : > { %p865_p13 = scmp.ne.s32.totalorder %s1091_s27, %s864_s29  ;;  %p866_p0 = pneg %p1093_p11 }
  0x33   : > { %s869_s6 = scalar_lea.hbm %s1209_s0, 2048  ;;  %p870_p7 = scmp.lt.u32.totalorder %s1091_s27, %s1209_s0 }
  0x34   : > { %p867_p3 = pnand %p866_p0, %p865_p13  ;;  %p871_p9 = scmp.lt.u32.totalorder %s869_s6, %s864_s29 }
  0x35   : > { %p873_p2 = scmp.lt.u32.totalorder %s864_s29, %s1091_s27 }
  0x36   : > { %p868_p5 = pneg %p867_p3  ;;  %p872_p1 = por %p871_p9, %p870_p7 }
  0x38   : > { %p874_p4 = por %p873_p2, %p872_p1 }
  0x3a   : > { %p875_p6 = pnand %p874_p4, %p868_p5 }
  0x3c   : > { %878 = shalt.err (!%p875_p6)
}
  0x3d   : > { %s879_s18 = scalar_lea.vmem %s1097_s22, 1024  ;;  %s969_s24 = smov [#allocation2]  }
  0x3e   : > { %p880_p8 = scmp.ne.s32.totalorder %s1097_s22, %s879_s18  ;;  %s884_s25 = sshll.u32 %s969_s24, 4  ;;  %s885_s25 = int_to_ptr.vmem [resolvable:$false] %s884_s25 }
  0x3f   : > { %s886_s26 = scalar_lea.vmem %s885_s25, 2048  ;;  %p887_p3 = scmp.lt.s32.totalorder %s1097_s22, %s885_s25 }
  0x40   : > { %p882_p10 = pnand %p880_p8, %p866_p0  ;;  %p888_p7 = scmp.lt.s32.totalorder %s886_s26, %s879_s18 }
  0x42   : > { %p883_p13 = pneg %p882_p10  ;;  %p889_p9 = por %p888_p7, %p887_p3 }
  0x44   : > { %p890_p1 = pnand %p889_p9, %p883_p13 }
  0x46   : > { %893 = shalt.err (!%p890_p1)
}
  0x47   : > { %774 = dma.hbm_to_vmem [thread:$0]  (!%p1093_p11), %s1091_s27, 1024, %s1097_s22, %s1099_s28, %s967_s4, %s967_s4, %s968_s5  }
  0x48   : > { %p1222_p0 = scmp.ne.s32.totalorder %s1217_s17, 0 }
  0x49   : > { %s1133_s19 = sand.u32 (!%p1222_p0), 1, %s956_s10   ;;  %p1223_p5 = scmp.ne.s32.totalorder (!%p1222_p0), %s1215_s15, 0 }
  0x4a   : > { %146 = sbr.rel (%p1222_p0) target bundleno = 358 (0x166), region = 28  ;;  %s590_s29 = sshll.u32 (!%p1222_p0), %s1133_s19, 6 }
  0x4b   : > { %s149_s30 = scalar_lea.sflag (!%p1222_p0), [#allocation3], %s1133_s19  ;;  %s1139_s23 = scalar_lea.vmem (!%p1222_p0), [#allocation2], %s590_s29 }
  0x51   : > { %939 = dma.done.wait (%p1223_p5), %s149_s30, 1024  }
  0x52   : > { %941 = vsyncadd (%p1223_p5), %s149_s30, 4294966272  ;;  %p1224_p11 = scmp.eq.s32.totalorder %s1009_s13, 0 }
  0x54   : > { %943 = dma.done.wait (%p1224_p11), [#allocation6], 1024   ;;  %p1225_p2 = pmov %p1224_p11 }
  0x55   : > { %v820_v0 = vld [vmem:[#allocation5] sm:$0xff]   ;;  %v821_v1 = vld [vmem:[#allocation5 + $0x8] sm:$0xff]   ;;  %v822_v2 = vld [vmem:[#allocation5 + $0x10] sm:$0xff]   ;;  %s176_s15 = scalar_lea.vmem [#allocation7], %s590_s29  ;;  %s647_s4 = sshll.u32 %s1009_s13, 10 }
  0x56   : > { %945 = vsyncadd (%p1225_p2), [#allocation6], 4294966272  ;;  %711 = vmatprep.subr.bf16.mxu0 %v820_v0  ;;  %743 = vmatprep.subr.bf16.mxu1 %v820_v0  ;;  %v823_v3 = vld [vmem:[#allocation5 + $0x18] sm:$0xff]   ;;  %v828_v4 = vld [vmem:[%s1139_s23] sm:$0xff]   ;;  %s499_s17 = sshll.u32 %s176_s15, 4  ;;  %s1165_s22 = scalar_lea.hbm %s1211_s2, %s647_s4  ;;  %s1160_s17 = int_to_ptr.vmem [resolvable:$true] %s499_s17 }
  0x57   : > { %712 = vmatpush3.bf16.msra.mxu0 %v820_v0  ;;  %751 = vmatpush3.bf16.msra.mxu1 %v820_v0  ;;  %v829_v5 = vld [vmem:[%s1139_s23 + $0x20] sm:$0xff]   ;;  %v825_v7 = vld [vmem:[#allocation5 + $0x28] sm:$0xff]   ;;  %v826_v8 = vld [vmem:[#allocation5 + $0x30] sm:$0xff]   ;;  %s486_s13 = scalar_lea.sflag [#allocation4], %s1133_s19  ;;  %s894_s28 = scalar_lea.vmem %s1160_s17, 1024 }
  0x58   : > { %713 = vmatprep.subr.bf16.mxu0 %v821_v1  ;;  %744 = vmatprep.subr.bf16.mxu1 %v821_v1  ;;  %v824_v6 = vld [vmem:[#allocation5 + $0x20] sm:$0xff]   ;;  %v827_v9 = vld [vmem:[#allocation5 + $0x38] sm:$0xff]   ;;  %v830_v10 = vld [vmem:[%s1139_s23 + $0x8] sm:$0xff]   ;;  %p895_p4 = scmp.ne.s32.totalorder %s1160_s17, %s894_s28  ;;  %s970_s3 = smov [#allocation7]  }
  0x59   : > { %727 = vmatprep.mubr.bf16.mxu0 %v828_v4  ;;  %735 = vmatprep.mubr.bf16.mxu1 %v829_v5  ;;  %v831_v11 = vld [vmem:[%s1139_s23 + $0x28] sm:$0xff]   ;;  %v832_v12 = vld [vmem:[%s1139_s23 + $0x10] sm:$0xff]   ;;  %v834_v14 = vld [vmem:[%s1139_s23 + $0x18] sm:$0xff]   ;;  %s898_s6 = sshll.u32 %s970_s3, 4  ;;  %s899_s6 = int_to_ptr.vmem [resolvable:$false] %s898_s6 }
  0x5a   : > { %v833_v13 = vld [vmem:[%s1139_s23 + $0x30] sm:$0xff]   ;;  %v835_v15 = vld [vmem:[%s1139_s23 + $0x38] sm:$0xff]   ;;  %p896_p6 = pnand %p895_p4, %p1082_p12  ;;  %s900_s7 = scalar_lea.vmem %s899_s6, 2048 }
  0x5b   : > { %714 = vmatpush3.bf16.msra.mxu0 %v821_v1  ;;  %752 = vmatpush3.bf16.msra.mxu1 %v821_v1  ;;  %p901_p10 = scmp.lt.s32.totalorder %s1160_s17, %s899_s6  ;;  %p902_p13 = scmp.lt.s32.totalorder %s900_s7, %s894_s28 }
  0x5c   : > { %715 = vmatprep.subr.bf16.mxu0 %v822_v2  ;;  %745 = vmatprep.subr.bf16.mxu1 %v822_v2  ;;  %p897_p8 = pneg %p896_p6 }
  0x5d   : > { %p903_p3 = por %p902_p13, %p901_p10 }
  0x5f   : > { %716 = vmatpush3.bf16.msra.mxu0 %v822_v2  ;;  %753 = vmatpush3.bf16.msra.mxu1 %v822_v2  ;;  %p904_p7 = pnand %p903_p3, %p897_p8 }
  0x60   : > { %717 = vmatprep.subr.bf16.mxu0 %v823_v3  ;;  %746 = vmatprep.subr.bf16.mxu1 %v823_v3 }
  0x63   : > { %718 = vmatpush3.bf16.msra.mxu0 %v823_v3  ;;  %754 = vmatpush3.bf16.msra.mxu1 %v823_v3 }
  0x64   : > { %719 = vmatprep.subr.bf16.mxu0 %v824_v6  ;;  %747 = vmatprep.subr.bf16.mxu1 %v824_v6 }
  0x67   : > { %720 = vmatpush3.bf16.msra.mxu0 %v824_v6  ;;  %755 = vmatpush3.bf16.msra.mxu1 %v824_v6 }
  0x68   : > { %721 = vmatprep.subr.bf16.mxu0 %v825_v7  ;;  %748 = vmatprep.subr.bf16.mxu1 %v825_v7 }
  0x6b   : > { %722 = vmatpush3.bf16.msra.mxu0 %v825_v7  ;;  %756 = vmatpush3.bf16.msra.mxu1 %v825_v7 }
  0x6c   : > { %723 = vmatprep.subr.bf16.mxu0 %v826_v8  ;;  %749 = vmatprep.subr.bf16.mxu1 %v826_v8 }
  0x6f   : > { %724 = vmatpush3.bf16.msra.mxu0 %v826_v8  ;;  %757 = vmatpush3.bf16.msra.mxu1 %v826_v8 }
  0x70   : > { %725 = vmatprep.subr.bf16.mxu0 %v827_v9  ;;  %750 = vmatprep.subr.bf16.mxu1 %v827_v9 }
  0x73   : > { %726 = vmatpush3.bf16.msra.mxu0 %v827_v9  ;;  %758 = vmatpush3.bf16.msra.mxu1 %v827_v9 }
  0x76   : > { %728 = vmatmul.mubr.bf16.vlgmr.msra.gmra.mrb[0].mxu0 %v830_v10  ;;  %736 = vmatmul.mubr.bf16.vlgmr.msra.gmra.mrb[0].mxu1 %v831_v11 }
  0x77   : > { %731 = vmatprep.mubr.bf16.mxu0 %v832_v12  ;;  %739 = vmatprep.mubr.bf16.mxu1 %v833_v13 }
  0x7e   : > { %732 = vmatmul.mubr.bf16.gmra.mrb[4].mxu0 %v834_v14  ;;  %740 = vmatmul.mubr.bf16.gmra.mrb[4].mxu1 %v835_v15 }
 0x149   : > { %v729_v16 = vpop.f32.mrb[0].mxu0  ;;  %v737_v17 = vpop.f32.mrb[0].mxu1 }
 0x14a   : > { %v342_v18 = vpop.f32.mrb[1].mxu0  ;;  %v374_v19 = vpop.f32.mrb[1].mxu1 }
 0x14b   : > { %v730_v20 = vpop.f32.mrb[2].mxu0  ;;  %v738_v21 = vpop.f32.mrb[2].mxu1 }
 0x14c   : > { %v656_v22 = vpack.c.bf16 %v730_v20, %v729_v16  ;;  %v676_v23 = vpack.c.bf16 %v738_v21, %v737_v17  ;;  %v345_v24 = vpop.f32.mrb[3].mxu0  ;;  %v377_v25 = vpop.f32.mrb[3].mxu1 }
 0x14d   : > { %v651_v26 = vpack.c.bf16 %v345_v24, %v342_v18  ;;  %v671_v27 = vpack.c.bf16 %v377_v25, %v374_v19 }
 0x14e   : > { %688 = vst [vmem:[%s176_s15 + $0x8] sm:$0xff] %v656_v22   ;;  %692 = vst [vmem:[%s176_s15 + $0x28] sm:$0xff] %v676_v23  }
 0x14f   : > { %652 = vst [vmem:[%s176_s15] sm:$0xff] %v651_v26   ;;  %691 = vst [vmem:[%s176_s15 + $0x20] sm:$0xff] %v671_v27  }
 0x151   : > { %v733_v28 = vpop.f32.mrb[4].mxu0  ;;  %v741_v29 = vpop.f32.mrb[4].mxu1 }
 0x152   : > { %v358_v30 = vpop.f32.mrb[5].mxu0  ;;  %v390_v31 = vpop.f32.mrb[5].mxu1 }
 0x153   : > { %v734_v32 = vpop.f32.mrb[6].mxu0  ;;  %v742_v33 = vpop.f32.mrb[6].mxu1 }
 0x154   : > { %v666_v34 = vpack.c.bf16 %v734_v32, %v733_v28  ;;  %v686_v35 = vpack.c.bf16 %v742_v33, %v741_v29  ;;  %v361_v36 = vpop.f32.mrb[7].mxu0  ;;  %v393_v37 = vpop.f32.mrb[7].mxu1 }
 0x155   : > { %v661_v38 = vpack.c.bf16 %v361_v36, %v358_v30  ;;  %v681_v39 = vpack.c.bf16 %v393_v37, %v390_v31 }
 0x156   : > { %690 = vst [vmem:[%s176_s15 + $0x18] sm:$0xff] %v666_v34   ;;  %694 = vst [vmem:[%s176_s15 + $0x38] sm:$0xff] %v686_v35  }
 0x157   : > { %689 = vst [vmem:[%s176_s15 + $0x10] sm:$0xff] %v661_v38   ;;  %693 = vst [vmem:[%s176_s15 + $0x30] sm:$0xff] %v681_v39  }
 0x158   : > { %907 = shalt.err (!%p904_p7)
}
 0x159   : > { %s908_s20 = scalar_lea.hbm %s1165_s22, 1024  ;;  %s912_s25 = scalar_lea.hbm %s1211_s2, 2048 }
 0x15a   : > { %p909_p9 = scmp.ne.s32.totalorder %s1165_s22, %s908_s20  ;;  %p913_p5 = scmp.lt.u32.totalorder %s1165_s22, %s1211_s2 }
 0x15b   : > { %p914_p11 = scmp.lt.u32.totalorder %s912_s25, %s908_s20  ;;  %p916_p4 = scmp.lt.u32.totalorder %s908_s20, %s1165_s22 }
 0x15c   : > { %p910_p1 = pnand %p909_p9, %p1082_p12 }
 0x15d   : > { %p915_p2 = por %p914_p11, %p913_p5 }
 0x15e   : > { %p911_p0 = pneg %p910_p1 }
 0x15f   : > { %p917_p6 = por %p916_p4, %p915_p2 }
 0x161   : > { %p918_p8 = pnand %p917_p6, %p911_p0 }
 0x163   : > { %921 = shalt.err (!%p918_p8)
}
 0x164   : > { %s971_s30 = smov 64   ;;  %s972_s23 = smov 4  }
 0x165   : > { %765 = dma.vmem_to_hbm [thread:$0]  (%p1082_p12), %s1160_s17, 1024, %s1165_s22, %s486_s13, %s971_s30, %s971_s30, %s972_s23  }
 0x166 PF: > { %s514_s15 = sand.u32 1, %s952_s9   ;;  %p1226_p10 = scmp.ne.s32.totalorder %s1216_s16, 0 }
 0x167   : > { %p1227_p13 = scmp.ge.s32.totalorder %s964_s12, 2  ;;  %s515_s4 = scalar_lea.sflag [#allocation4], %s514_s15 }
 0x169   : > { %p776_p3 = pnand %p1227_p13, %p1226_p10 }
 0x16b   : > { %947 = dma.done.wait (!%p776_p3), %s515_s4, 1024  }
 0x16c   : > { %949 = vsyncadd (!%p776_p3), %s515_s4, 4294966272  ;;  %p16_p7 = scmp.ge.s32.totalorder %s1044_s21, 4   ;;  %s1228_s9 = smov %s956_s10 }
 0x16d   : > { %s1229_s10 = smov %s960_s11  ;;  %s1230_s11 = smov %s1078_s8 }
 0x16e   : > { %s1231_s12 = smov %s1044_s21  ;;  %18 = sbr.rel (!%p16_p7) target bundleno = 6 (0x6), region = 77 }
 0x175   :  { %520 = vsyncpa [#allocation3], 1 }
 0x176   :  { %522 = vsyncpa [#allocation3 + $0x1], 1 }
 0x177   :  { %523 = vsyncpa [#allocation6], 1 }
 0x178   :  { %524 = vsyncpa [#allocation4], 1 }
 0x179   :  { %526 = vsyncpa [#allocation4 + $0x1], 1 }

</bundles_post_ra>
